<compile_context>
chip_gen: v7x
topology: tpu7x:2x2x1
jax: 0.10.0
libtpu: 0.0.40
codegen_flags: <defaults>
</compile_context>

<pallas_src>
import math
import jax
import jax.numpy as jnp
from jax.experimental import pallas as pl
from jax.experimental.pallas import tpu as pltpu


# ---------------------------------------------------------------------------
# Kernels
# ---------------------------------------------------------------------------

def gru2d_cell_kernel(ig_ref, s0_ref, s1_ref, ws_ref, bsn_ref, h_ref):
    """One batch tile of the GRU2d cell (single step).

    ig_ref : (tb, 4S) f32   precomputed x @ Wi^T + (bi + bs)   [4S = 128 lanes]
    s0_ref : (tb, S)        s_prev0 (original dtype, blended in f32)
    s1_ref : (tb, S)        s_prev1
    ws_ref : (2S, 4S)       Ws^T, VMEM-resident, compute dtype (MXU operand)
    bsn_ref: (1, S)  f32    bs[2S:3S] (bias of the n-chunk of sgates)
    """
    S = s0_ref.shape[-1]
    cdt = ws_ref.dtype

    s0 = s0_ref[...]
    s1 = s1_ref[...]
    s0f = s0.astype(jnp.float32)
    s1f = s1.astype(jnp.float32)

    # sgates (bias folded out): two K=S MXU matmuls accumulating in f32;
    # ws_ref row slices are static (zero-cost views, 8-sublane aligned).
    sg_nb = (jnp.dot(s0.astype(cdt), ws_ref[:S, :],
                     preferred_element_type=jnp.float32)
             + jnp.dot(s1.astype(cdt), ws_ref[S:, :],
                       preferred_element_type=jnp.float32))

    # gates = igates + sgates (bi + bs already folded into igates).
    gates = ig_ref[...] + sg_nb

    # One EUP pass over the full lane-dense (tb, 4S) slab.
    sgm = jax.nn.sigmoid(gates)
    r_inv = sgm[:, 0 * S:1 * S]
    i_g = sgm[:, 1 * S:2 * S]
    l_g = sgm[:, 3 * S:4 * S]

    s_n = sg_nb[:, 2 * S:3 * S] + bsn_ref[...]
    n = jnp.tanh(gates[:, 2 * S:3 * S] - r_inv * s_n)

    # h = n + i*(l*s0 + (1-l)*s1 - n) rewritten to drop the (1-l) broadcast.
    h = n + i_g * (s1f + l_g * (s0f - s1f) - n)
    h_ref[...] = h.astype(h_ref.dtype)


def gru2d_scan_kernel(ig_ref, s1_ref, s0i_ref, ws_ref, bsn_ref, h_ref, s0_c):
    """Fused recurrence: per grid step (batch_tile i, time t) one cell update.

    The carried state s_prev0 lives in the VMEM scratch `s0_c` across the
    "arbitrary" time axis; s_prev1 and igates are streamed per step.
    """
    S = s0_c.shape[-1]
    cdt = ws_ref.dtype
    t = pl.program_id(1)

    @pl.when(t == 0)
    def _():
        s0_c[...] = s0i_ref[...].astype(jnp.float32)

    s0 = s0_c[...]                        # (tb, S) f32 carried state
    s1 = s1_ref[0]
    s1f = s1.astype(jnp.float32)

    sg_nb = (jnp.dot(s0.astype(cdt), ws_ref[:S, :],
                     preferred_element_type=jnp.float32)
             + jnp.dot(s1.astype(cdt), ws_ref[S:, :],
                       preferred_element_type=jnp.float32))
    gates = ig_ref[0] + sg_nb

    sgm = jax.nn.sigmoid(gates)
    r_inv = sgm[:, 0 * S:1 * S]
    i_g = sgm[:, 1 * S:2 * S]
    l_g = sgm[:, 3 * S:4 * S]

    s_n = sg_nb[:, 2 * S:3 * S] + bsn_ref[...]
    n = jnp.tanh(gates[:, 2 * S:3 * S] - r_inv * s_n)
    h = n + i_g * (s1f + l_g * (s0 - s1f) - n)

    h_ref[0] = h.astype(h_ref.dtype)
    s0_c[...] = h                         # becomes s_prev0 of step t+1


# ---------------------------------------------------------------------------
# Wrappers
# ---------------------------------------------------------------------------

def _pick_tb(B, block_b):
    """Batch tile: multiple of 16, >=2 grid steps when B allows (v7x: 2 TCs)."""
    if B <= 16:
        return B
    half = -(-B // 2)                       # ceil(B/2) -> at least 2 tiles
    tb = -(-half // 16) * 16                # round up to 16 (bf16 row packing)
    return max(16, min(tb, block_b, -(-B // 16) * 16))


def _vmem_limit_bytes(est_bytes):
    """Generation-aware scoped-VMEM request (v7x has only 64 MiB physical)."""
    cap = 64 * 1024 * 1024
    try:
        cap = int(getattr(pltpu.get_tpu_info(), "vmem_capacity_bytes", cap))
    except Exception:
        pass
    cap = (cap * 4) // 5                    # ~20% headroom
    return int(min(cap, max(16 * 1024 * 1024, 2 * int(est_bytes))))


def prepare_gru2d_params(wi_w, wi_b, ws_w, ws_b, *, compute_dtype=jnp.bfloat16):
    """One-time parameter prep (transpose / cast / bias folding).

    wi_w: (4S, input_dim), ws_w: (4S, 2S)  (PyTorch nn.Linear layout).
    """
    S = int(wi_w.shape[0]) // 4
    wi_t = jnp.asarray(wi_w, jnp.float32).T                        # (in, 4S), f32 (XLA-side igates)
    ws_t = jnp.asarray(ws_w, jnp.float32).T.astype(compute_dtype)  # (2S, 4S), MXU operand
    bi = jnp.asarray(wi_b, jnp.float32)
    bs = jnp.asarray(ws_b, jnp.float32)
    b_total = (bi + bs).reshape(1, -1)                             # (1, 4S) folded bias
    bs_n = bs[2 * S:3 * S].reshape(1, -1)                          # (1, S) for the s_n term
    return {"wi_t": wi_t, "ws_t": ws_t, "b_total": b_total, "bs_n": bs_n}


def gru2d_cell_apply(x, s_prev0, s_prev1, params, *, block_b=512):
    """Single-step GRU2d cell (module forward), batch-tiled pallas_call."""
    B, S = s_prev0.shape
    g = 4 * S
    out_dtype = s_prev0.dtype
    wi_t, ws_t = params["wi_t"], params["ws_t"]
    b_total, bs_n = params["b_total"], params["bs_n"]

    # Hoisted input projection + folded biases (one XLA matmul, full MXU eff.).
    igates = x.astype(jnp.float32) @ wi_t + b_total                # (B, 4S) f32

    tb = _pick_tb(B, block_b)
    grid = (pl.cdiv(B, tb),)

    wsz = jnp.dtype(ws_t.dtype).itemsize
    ssz = jnp.dtype(s_prev0.dtype).itemsize
    osz = jnp.dtype(out_dtype).itemsize
    est = (2 * (2 * S * g * wsz + S * 4)            # resident Ws^T + bs_n (2 bufs)
           + 2 * (tb * g * 4 + 2 * tb * S * ssz)    # streamed igates + states
           + 2 * tb * S * osz                       # streamed output
           + 6 * tb * g * 4)                        # f32 gate intermediates

    return pl.pallas_call(
        gru2d_cell_kernel,
        out_shape=jax.ShapeDtypeStruct((B, S), out_dtype),
        grid=grid,
        in_specs=[
            pl.BlockSpec((tb, g), lambda i: (i, 0)),       # igates (lane-dense)
            pl.BlockSpec((tb, S), lambda i: (i, 0)),       # s_prev0
            pl.BlockSpec((tb, S), lambda i: (i, 0)),       # s_prev1
            pl.BlockSpec((2 * S, g), lambda i: (0, 0)),    # Ws^T (resident)
            pl.BlockSpec((1, S), lambda i: (0, 0)),        # bs_n (resident)
        ],
        out_specs=pl.BlockSpec((tb, S), lambda i: (i, 0)),
        compiler_params=pltpu.CompilerParams(
            dimension_semantics=("parallel",),
            vmem_limit_bytes=_vmem_limit_bytes(est)),
    )(igates, s_prev0, s_prev1, ws_t, bs_n)


def gru2d_scan_apply(x_seq, s0_init, s1_seq, params, *, block_b=512):
    """Fused T-step recurrence in ONE pallas_call.

    Step t applies the GRU2dCell forward with
        s_prev0 = s0_init            (t == 0)   else h[t-1]   (VMEM-carried)
        s_prev1 = s1_seq[t]          (streamed)
    and returns h for every step, shape (T, B, S).
    """
    T, B, in_dim = x_seq.shape
    S = s0_init.shape[-1]
    g = 4 * S
    out_dtype = s0_init.dtype
    wi_t, ws_t = params["wi_t"], params["ws_t"]
    b_total, bs_n = params["b_total"], params["bs_n"]

    # Input projection for ALL timesteps with one large XLA matmul.
    igates = (x_seq.reshape(T * B, in_dim).astype(jnp.float32) @ wi_t
              + b_total).reshape(T, B, g)

    tb = _pick_tb(B, block_b)
    grid = (pl.cdiv(B, tb), T)          # batch "parallel" first, time last

    wsz = jnp.dtype(ws_t.dtype).itemsize
    ssz = jnp.dtype(s1_seq.dtype).itemsize
    osz = jnp.dtype(out_dtype).itemsize
    est = (2 * (2 * S * g * wsz + S * 4 + tb * S * jnp.dtype(s0_init.dtype).itemsize)
           + 2 * (tb * g * 4 + tb * S * ssz)        # streamed igates + s1
           + 2 * tb * S * osz                       # streamed output
           + tb * S * 4                             # carried-state scratch
           + 6 * tb * g * 4)                        # f32 gate intermediates

    return pl.pallas_call(
        gru2d_scan_kernel,
        out_shape=jax.ShapeDtypeStruct((T, B, S), out_dtype),
        grid=grid,
        in_specs=[
            pl.BlockSpec((1, tb, g), lambda i, t: (t, i, 0)),   # igates[t]
            pl.BlockSpec((1, tb, S), lambda i, t: (t, i, 0)),   # s1_seq[t]
            pl.BlockSpec((tb, S), lambda i, t: (i, 0)),         # s0_init (resident per tile)
            pl.BlockSpec((2 * S, g), lambda i, t: (0, 0)),      # Ws^T (resident)
            pl.BlockSpec((1, S), lambda i, t: (0, 0)),          # bs_n (resident)
        ],
        out_specs=pl.BlockSpec((1, tb, S), lambda i, t: (t, i, 0)),
        scratch_shapes=[pltpu.VMEM((tb, S), jnp.float32)],      # carried s_prev0
        compiler_params=pltpu.CompilerParams(
            dimension_semantics=("parallel", "arbitrary"),
            vmem_limit_bytes=_vmem_limit_bytes(est)),
    )(igates, s1_seq, s0_init, ws_t, bs_n)


def gru2d_cell(x, s_prev0, s_prev1, wi_w, wi_b, ws_w, ws_b,
               *, compute_dtype=jnp.bfloat16, block_b=512):
    """Convenience wrapper: prep params + single-step apply."""
    params = prepare_gru2d_params(wi_w, wi_b, ws_w, ws_b,
                                  compute_dtype=compute_dtype)
    return gru2d_cell_apply(x, s_prev0, s_prev1, params, block_b=block_b)


def gru2d_cell_ref(x, s_prev0, s_prev1, wi_w, wi_b, ws_w, ws_b):
    """Pure-JAX reference mirroring the PyTorch forward exactly (f32)."""
    S = s_prev0.shape[-1]
    s = jnp.concatenate([s_prev0, s_prev1], axis=-1)
    igates = x @ wi_w.T + wi_b
    sgates = s @ ws_w.T + ws_b
    gates = igates + sgates
    r_inv, i_g, n_pre, l_g = jnp.split(gates, 4, axis=1)
    s_n = sgates[:, 2 * S:3 * S]
    l_g = jax.nn.sigmoid(l_g)
    r_inv = jax.nn.sigmoid(r_inv)
    i_g = jax.nn.sigmoid(i_g)
    n = jnp.tanh(n_pre - r_inv * s_n)
    h = n + i_g * (l_g * s_prev0 + (1.0 - l_g) * s_prev1 - n)
    return h


if __name__ == "__main__":
    batch = 256
    input_dim = 16
    state_dim = 32
    seq_len = 8

    key = jax.random.PRNGKey(0)
    (k_x, k_s0, k_s1, k_wi, k_bi, k_ws, k_bs, k_xs, k_s1s) = jax.random.split(key, 9)

    x = jax.random.normal(k_x, (batch, input_dim), dtype=jnp.float32)
    s_prev0 = jax.random.normal(k_s0, (batch, state_dim), dtype=jnp.float32)
    s_prev1 = jax.random.normal(k_s1, (batch, state_dim), dtype=jnp.float32)

    # nn.Linear-style init: U(-1/sqrt(fan_in), 1/sqrt(fan_in)).
    bound_i = 1.0 / math.sqrt(input_dim)
    bound_s = 1.0 / math.sqrt(2 * state_dim)
    wi_w = jax.random.uniform(k_wi, (4 * state_dim, input_dim),
                              minval=-bound_i, maxval=bound_i, dtype=jnp.float32)
    wi_b = jax.random.uniform(k_bi, (4 * state_dim,),
                              minval=-bound_i, maxval=bound_i, dtype=jnp.float32)
    ws_w = jax.random.uniform(k_ws, (4 * state_dim, 2 * state_dim),
                              minval=-bound_s, maxval=bound_s, dtype=jnp.float32)
    ws_b = jax.random.uniform(k_bs, (4 * state_dim,),
                              minval=-bound_s, maxval=bound_s, dtype=jnp.float32)

    # --- single-step cell (module forward semantics) -----------------------
    h_ref = gru2d_cell_ref(x, s_prev0, s_prev1, wi_w, wi_b, ws_w, ws_b)

    params_f32 = prepare_gru2d_params(wi_w, wi_b, ws_w, ws_b,
                                      compute_dtype=jnp.float32)
    h_f32 = jax.block_until_ready(
        gru2d_cell_apply(x, s_prev0, s_prev1, params_f32, block_b=128))
    assert h_f32.shape == (batch, state_dim)
    assert jnp.allclose(h_f32, h_ref, atol=1e-4, rtol=1e-4)

    params_bf16 = prepare_gru2d_params(wi_w, wi_b, ws_w, ws_b,
                                       compute_dtype=jnp.bfloat16)
    h_bf16 = jax.block_until_ready(
        gru2d_cell_apply(x, s_prev0, s_prev1, params_bf16, block_b=128))
    assert h_bf16.shape == (batch, state_dim)
    assert jnp.allclose(h_bf16, h_ref, atol=5e-2, rtol=5e-2)

    # --- fused T-step recurrence in one pallas_call -------------------------
    x_seq = jax.random.normal(k_xs, (seq_len, batch, input_dim), dtype=jnp.float32)
    s1_seq = jax.random.normal(k_s1s, (seq_len, batch, state_dim), dtype=jnp.float32)

    h_seq = jax.block_until_ready(
        gru2d_scan_apply(x_seq, s_prev0, s1_seq, params_f32, block_b=128))
    assert h_seq.shape == (seq_len, batch, state_dim)

    s0 = s_prev0
    refs = []
    for t in range(seq_len):
        s0 = gru2d_cell_ref(x_seq[t], s0, s1_seq[t], wi_w, wi_b, ws_w, ws_b)
        refs.append(s0)
    h_seq_ref = jnp.stack(refs, axis=0)
    assert jnp.allclose(h_seq, h_seq_ref, atol=1e-3, rtol=1e-3)

    print("KERNEL_OK")
</pallas_src>

<mosaic_0001>
module attributes {stable_mosaic.version = 11 : i64} {
  func.func @gru2d_cell_kernel(%arg0: i32, %arg1: memref<128x128xf32, #tpu.memory_space<vmem>>, %arg2: memref<128x32xf32, #tpu.memory_space<vmem>>, %arg3: memref<128x32xf32, #tpu.memory_space<vmem>>, %arg4: memref<64x128xf32, #tpu.memory_space<vmem>>, %arg5: memref<1x32xf32, #tpu.memory_space<vmem>>, %arg6: memref<128x32xf32, #tpu.memory_space<vmem>>) attributes {dimension_semantics = [#tpu.dimension_semantics<parallel>], iteration_bounds = array<i64: 2>, scalar_prefetch = 0 : i64, scratch_operands = 0 : i64, tpu.core_type = #tpu.core_type<tc>, window_params = [{transform_indices = @transform_0, window_bounds = array<i64: 128, 128>}, {transform_indices = @transform_1, window_bounds = array<i64: 128, 32>}, {transform_indices = @transform_2, window_bounds = array<i64: 128, 32>}, {pipeline_mode = #tpu.pipeline_mode<synchronous>, transform_indices = @transform_3, window_bounds = array<i64: 64, 128>}, {pipeline_mode = #tpu.pipeline_mode<synchronous>, transform_indices = @transform_4, window_bounds = array<i64: 1, 32>}, {transform_indices = @transform_5, window_bounds = array<i64: 128, 32>}]} {
    %c0 = arith.constant 0 : index
    %c0_0 = arith.constant 0 : index
    %0 = vector.load %arg2[%c0, %c0_0] : memref<128x32xf32, #tpu.memory_space<vmem>>, vector<128x32xf32>
    %c0_1 = arith.constant 0 : index
    %c0_2 = arith.constant 0 : index
    %1 = vector.load %arg3[%c0_1, %c0_2] : memref<128x32xf32, #tpu.memory_space<vmem>>, vector<128x32xf32>
    %c0_3 = arith.constant 0 : index
    %c0_4 = arith.constant 0 : index
    %2 = vector.load %arg4[%c0_3, %c0_4] : memref<64x128xf32, #tpu.memory_space<vmem>>, vector<32x128xf32>
    %cst = arith.constant dense<0.000000e+00> : vector<128x128xf32>
    %3 = tpu.matmul %0, %2, %cst {dimension_numbers = #tpu.dot_dimension_numbers<[1], [0], [0], [1], [0, 0, 1, 1], [], []>} : vector<128x32xf32>, vector<32x128xf32>, vector<128x128xf32> -> vector<128x128xf32>
    %c32 = arith.constant 32 : index
    %c0_5 = arith.constant 0 : index
    %4 = vector.load %arg4[%c32, %c0_5] : memref<64x128xf32, #tpu.memory_space<vmem>>, vector<32x128xf32>
    %cst_6 = arith.constant dense<0.000000e+00> : vector<128x128xf32>
    %5 = tpu.matmul %1, %4, %cst_6 {dimension_numbers = #tpu.dot_dimension_numbers<[1], [0], [0], [1], [0, 0, 1, 1], [], []>} : vector<128x32xf32>, vector<32x128xf32>, vector<128x128xf32> -> vector<128x128xf32>
    %6 = arith.addf %3, %5 : vector<128x128xf32>
    %c0_7 = arith.constant 0 : index
    %c0_8 = arith.constant 0 : index
    %7 = vector.load %arg1[%c0_7, %c0_8] : memref<128x128xf32, #tpu.memory_space<vmem>>, vector<128x128xf32>
    %8 = arith.addf %7, %6 : vector<128x128xf32>
    %9 = arith.negf %8 : vector<128x128xf32>
    %10 = math.exp %9 : vector<128x128xf32>
    %cst_9 = arith.constant 1.000000e+00 : f32
    %11 = vector.broadcast %cst_9 : f32 to vector<128x128xf32>
    %12 = arith.addf %11, %10 : vector<128x128xf32>
    %13 = arith.divf %11, %12 : vector<128x128xf32>
    %14 = vector.extract_strided_slice %13 {offsets = [0, 0], sizes = [128, 32], strides = [1, 1]} : vector<128x128xf32> to vector<128x32xf32>
    %15 = vector.extract_strided_slice %13 {offsets = [0, 32], sizes = [128, 32], strides = [1, 1]} : vector<128x128xf32> to vector<128x32xf32>
    %16 = vector.extract_strided_slice %13 {offsets = [0, 96], sizes = [128, 32], strides = [1, 1]} : vector<128x128xf32> to vector<128x32xf32>
    %17 = vector.extract_strided_slice %6 {offsets = [0, 64], sizes = [128, 32], strides = [1, 1]} : vector<128x128xf32> to vector<128x32xf32>
    %c0_10 = arith.constant 0 : index
    %c0_11 = arith.constant 0 : index
    %18 = vector.load %arg5[%c0_10, %c0_11] : memref<1x32xf32, #tpu.memory_space<vmem>>, vector<1x32xf32>
    %19 = vector.broadcast %18 : vector<1x32xf32> to vector<128x32xf32>
    %20 = arith.addf %17, %19 : vector<128x32xf32>
    %21 = vector.extract_strided_slice %8 {offsets = [0, 64], sizes = [128, 32], strides = [1, 1]} : vector<128x128xf32> to vector<128x32xf32>
    %22 = arith.mulf %14, %20 : vector<128x32xf32>
    %23 = arith.subf %21, %22 : vector<128x32xf32>
    %24 = math.tanh %23 : vector<128x32xf32>
    %25 = arith.subf %0, %1 : vector<128x32xf32>
    %26 = arith.mulf %16, %25 : vector<128x32xf32>
    %27 = arith.addf %1, %26 : vector<128x32xf32>
    %28 = arith.subf %27, %24 : vector<128x32xf32>
    %29 = arith.mulf %15, %28 : vector<128x32xf32>
    %30 = arith.addf %24, %29 : vector<128x32xf32>
    %c0_12 = arith.constant 0 : index
    %c0_13 = arith.constant 0 : index
    %31 = vector.load %arg6[%c0_12, %c0_13] : memref<128x32xf32, #tpu.memory_space<vmem>>, vector<128x32xf32>
    tpu.vector_store %arg6[%c0_12, %c0_13], %30 {strides = array<i32>} : memref<128x32xf32, #tpu.memory_space<vmem>>, vector<128x32xf32>,
    return
  }
  func.func @transform_0(%arg0: i32) -> (i32, i32) {
    %c0_i32 = arith.constant 0 : i32
    %c0_i32_0 = arith.constant 0 : i32
    return %arg0, %c0_i32 : i32, i32
  }
  func.func @transform_1(%arg0: i32) -> (i32, i32) {
    %c0_i32 = arith.constant 0 : i32
    %c0_i32_0 = arith.constant 0 : i32
    return %arg0, %c0_i32 : i32, i32
  }
  func.func @transform_2(%arg0: i32) -> (i32, i32) {
    %c0_i32 = arith.constant 0 : i32
    %c0_i32_0 = arith.constant 0 : i32
    return %arg0, %c0_i32 : i32, i32
  }
  func.func @transform_3(%arg0: i32) -> (i32, i32) {
    %c0_i32 = arith.constant 0 : i32
    %c0_i32_0 = arith.constant 0 : i32
    %c0_i32_1 = arith.constant 0 : i32
    return %c0_i32, %c0_i32_0 : i32, i32
  }
  func.func @transform_4(%arg0: i32) -> (i32, i32) {
    %c0_i32 = arith.constant 0 : i32
    %c0_i32_0 = arith.constant 0 : i32
    %c0_i32_1 = arith.constant 0 : i32
    return %c0_i32, %c0_i32_0 : i32, i32
  }
  func.func @transform_5(%arg0: i32) -> (i32, i32) {
    %c0_i32 = arith.constant 0 : i32
    %c0_i32_0 = arith.constant 0 : i32
    return %arg0, %c0_i32 : i32, i32
  }
}

</mosaic_0001>

<bundles_post_ra>
// kernel: tpu_custom_call.1
= control target key start
LH: loop header
LB: loop body
LE: loop exit
PB: predicated region body
PF: predicated region fallthrough
CT: control target
= control target key end

     0   :  { %s1952_s18 = smov 0   ;;  %s2691_s0 = inlined_call_operand.vmem [shape: f32[256,128], index: 0, kind: input, shape index: {}]   ;;  %s2692_s1 = inlined_call_operand.vmem [shape: f32[256,32], index: 1, kind: input, shape index: {}]   ;;  %s2693_s2 = inlined_call_operand.vmem [shape: f32[256,32], index: 2, kind: input, shape index: {}]   ;;  %s2694_s3 = inlined_call_operand.vmem [shape: f32[64,128], index: 3, kind: input, shape index: {}]   ;;  %s2695_s4 = inlined_call_operand.vmem [shape: f32[1,32], index: 4, kind: input, shape index: {}]   ;;  %s2696_s5 = inlined_call_operand.vmem [shape: f32[256,32], index: 5, kind: output, shape index: {}]  }
   0x1 LB: > { %s1604_s19 = sadd.s32 4294967295, %s1917_s18   ;;  %p1608_p0 = scmp.ge.s32.totalorder %s1917_s18, 1  ;;  %s1917_s18 = sphi %s1952_s18, %s15_s18  }
   0x2   : > { %p210_p1 = scmp.lt.s32.totalorder %s1917_s18, 3 }
   0x4   : > { %p211_p2 = pnand %p1608_p0, %p210_p1 }
   0x6   : > { %214 = sbr.rel (%p211_p2) target bundleno = 1011 (0x3f3), region = 40 }
   0xd   : > { %v308_v0 = vld [vmem:[%s2694_s3 + $0x20] sm:$0xff]  ;;  %v309_v1 = vld [vmem:[%s2694_s3 + $0x28] sm:$0xff]  ;;  %s1609_s26 = sshll.u32 %s1604_s19, 4  ;;  %v310_v5 = vld [vmem:[%s2694_s3 + $0x30] sm:$0xff]  ;;  %s1919_s14 = smov 64   ;;  %vm312_vm0 = vcmask 261120  }
   0xe   : > { %v304_v2 = vld [vmem:[%s2694_s3] sm:$0xff]  ;;  %v1772_v3 = vpack.c.bf16 %v309_v1, %v308_v0  ;;  %v305_v4 = vld [vmem:[%s2694_s3 + $0x8] sm:$0xff]  ;;  %v311_v6 = vld [vmem:[%s2694_s3 + $0x38] sm:$0xff]  ;;  %p249_p3 = scmp.lt.s32.totalorder %s1609_s26, 31  ;;  %s1920_s23 = smov 96  }
   0xf   : > { %v1780_v7 = vpack.c.bf16 %v305_v4, %v304_v2  ;;  %v1776_v8 = vpack.c.bf16 %v311_v6, %v310_v5  ;;  %v306_v9 = vld [vmem:[%s2694_s3 + $0x10] sm:$0xff]  ;;  %v307_v10 = vld [vmem:[%s2694_s3 + $0x18] sm:$0xff]  ;;  %v1665_v11 = vld [vmem:[%s2695_s4] ss:$0 sm:$0xff]  ;;  %s1921_s27 = smov 32  }
  0x10   : > { %1773 = vmatprep.subr.bf16.mxu1 %v1772_v3  ;;  %v1784_v12 = vpack.c.bf16 %v307_v10, %v306_v9  ;;  %s2734_s26 = smov (!%p249_p3, %s1609_s26), 31  ;;  %833 = vrot.lane.b32.xlu0 %v1665_v11, %s1919_s14 }
  0x11   : > { %1781 = vmatprep.subr.bf16.mxu0 %v1780_v7  ;;  %1775 = vmatpush3.bf16.msra.mxu1 %v1772_v3  ;;  %s1988_s15 = sshll.u32 %s2734_s26, 3 }
  0x12   : > { %1783 = vmatpush3.bf16.msra.mxu0 %v1780_v7  ;;  %1777 = vmatprep.subr.bf16.mxu1 %v1776_v8  ;;  %s1994_s19 = scalar_lea.vmem %s2693_s2, %s1988_s15  ;;  %s2000_s22 = scalar_lea.vmem %s2692_s1, %s1988_s15 }
  0x13   : > { %1785 = vmatprep.subr.bf16.mxu0 %v1784_v12  ;;  %v2003_v13 = vld [vmem:[%s1994_s19] sm:$0xff]  ;;  %v2011_v15 = vld [vmem:[%s1994_s19 + $0x8] sm:$0xff]  ;;  %v2019_v17 = vld [vmem:[%s1994_s19 + $0x10] sm:$0xff]  ;;  %s2284_s26 = scalar_lea.vmem %s2691_s0, %s1988_s15  ;;  %s2654_s30 = scalar_lea.vmem %s2696_s5, %s1988_s15 }
  0x14   : > { %v2006_v14 = vld [vmem:[%s2000_s22] sm:$0xff]  ;;  %1716 = vmatprep.mubr.msk.f32.mxu1 %vm312_vm0, %v2003_v13  ;;  %v2016_v16 = vld [vmem:[%s2000_s22 + $0x8] sm:$0xff]  ;;  %v2022_v18 = vld [vmem:[%s2000_s22 + $0x10] sm:$0xff] }
  0x15   : > { %1779 = vmatpush3.bf16.msra.mxu1 %v1776_v8  ;;  %1748 = vmatprep.mubr.msk.f32.mxu0 %vm312_vm0, %v2006_v14  ;;  %v2031_v19 = vld [vmem:[%s1994_s19 + $0x18] sm:$0xff]  ;;  %v2039_v21 = vld [vmem:[%s1994_s19 + $0x20] sm:$0xff]  ;;  %v2051_v23 = vld [vmem:[%s1994_s19 + $0x28] sm:$0xff] }
  0x16   : > { %1787 = vmatpush3.bf16.msra.mxu0 %v1784_v12  ;;  %v2036_v20 = vld [vmem:[%s2000_s22 + $0x18] sm:$0xff]  ;;  %v2042_v22 = vld [vmem:[%s2000_s22 + $0x20] sm:$0xff]  ;;  %v2056_v24 = vld [vmem:[%s2000_s22 + $0x28] sm:$0xff] }
  0x17   : > { %v2059_v25 = vld [vmem:[%s1994_s19 + $0x30] sm:$0xff]  ;;  %v2071_v27 = vld [vmem:[%s1994_s19 + $0x38] sm:$0xff]  ;;  %v2079_v29 = vld [vmem:[%s1994_s19 + $0x40] sm:$0xff] }
  0x18   : > { %1717 = vmatmul.mubr.msk.f32.vlgmr.msra.gmra.mrb[0].mxu1 %vm312_vm0, %v2011_v15  ;;  %v2062_v26 = vld [vmem:[%s2000_s22 + $0x30] sm:$0xff]  ;;  %v2076_v28 = vld [vmem:[%s2000_s22 + $0x38] sm:$0xff]  ;;  %v2082_v30 = vld [vmem:[%s2000_s22 + $0x40] sm:$0xff] }
  0x19   : > { %1749 = vmatmul.mubr.msk.f32.vlgmr.msra.gmra.mrb[0].mxu0 %vm312_vm0, %v2016_v16  ;;  %1719 = vmatprep.mubr.msk.f32.mxu1 %vm312_vm0, %v2019_v17  ;;  %v2091_v31 = vld [vmem:[%s1994_s19 + $0x48] sm:$0xff]  ;;  %v2099_v33 = vld [vmem:[%s1994_s19 + $0x50] sm:$0xff]  ;;  %v2111_v35 = vld [vmem:[%s1994_s19 + $0x58] sm:$0xff] }
  0x1a   : > { %1751 = vmatprep.mubr.msk.f32.mxu0 %vm312_vm0, %v2022_v18  ;;  %v2096_v32 = vld [vmem:[%s2000_s22 + $0x48] sm:$0xff]  ;;  %v2102_v34 = vld [vmem:[%s2000_s22 + $0x50] sm:$0xff]  ;;  %v2116_v36 = vld [vmem:[%s2000_s22 + $0x58] sm:$0xff] }
  0x1b   : > { %v2119_v37 = vld [vmem:[%s1994_s19 + $0x60] sm:$0xff]  ;;  %v2131_v39 = vld [vmem:[%s1994_s19 + $0x68] sm:$0xff]  ;;  %v2139_v41 = vld [vmem:[%s1994_s19 + $0x70] sm:$0xff] }
  0x1c   : > { %1720 = vmatmul.mubr.msk.f32.gmra.mrb[2].mxu1 %vm312_vm0, %v2031_v19  ;;  %v2122_v38 = vld [vmem:[%s2000_s22 + $0x60] sm:$0xff]  ;;  %v2136_v40 = vld [vmem:[%s2000_s22 + $0x68] sm:$0xff]  ;;  %v2142_v42 = vld [vmem:[%s2000_s22 + $0x70] sm:$0xff] }
  0x1d   : > { %1752 = vmatmul.mubr.msk.f32.gmra.mrb[2].mxu0 %vm312_vm0, %v2036_v20  ;;  %1722 = vmatprep.mubr.msk.f32.mxu1 %vm312_vm0, %v2039_v21  ;;  %v2151_v43 = vld [vmem:[%s1994_s19 + $0x78] sm:$0xff] }
  0x1e   : > { %1754 = vmatprep.mubr.msk.f32.mxu0 %vm312_vm0, %v2042_v22  ;;  %v2156_v44 = vld [vmem:[%s2000_s22 + $0x78] sm:$0xff] }
  0x20   : > { %1723 = vmatmul.mubr.msk.f32.gmra.mrb[4].mxu1 %vm312_vm0, %v2051_v23 }
  0x21   : > { %1755 = vmatmul.mubr.msk.f32.gmra.mrb[4].mxu0 %vm312_vm0, %v2056_v24  ;;  %1725 = vmatprep.mubr.msk.f32.mxu1 %vm312_vm0, %v2059_v25 }
  0x22   : > { %1757 = vmatprep.mubr.msk.f32.mxu0 %vm312_vm0, %v2062_v26 }
  0x24   : > { %1726 = vmatmul.mubr.msk.f32.gmra.mrb[6].mxu1 %vm312_vm0, %v2071_v27 }
  0x25   : > { %1758 = vmatmul.mubr.msk.f32.gmra.mrb[6].mxu0 %vm312_vm0, %v2076_v28  ;;  %1728 = vmatprep.mubr.msk.f32.mxu1 %vm312_vm0, %v2079_v29 }
  0x26   : > { %1760 = vmatprep.mubr.msk.f32.mxu0 %vm312_vm0, %v2082_v30 }
  0x28   : > { %1729 = vmatmul.mubr.msk.f32.gmra.mrb[8].mxu1 %vm312_vm0, %v2091_v31 }
  0x29   : > { %1761 = vmatmul.mubr.msk.f32.gmra.mrb[8].mxu0 %vm312_vm0, %v2096_v32  ;;  %1731 = vmatprep.mubr.msk.f32.mxu1 %vm312_vm0, %v2099_v33 }
  0x2a   : > { %1763 = vmatprep.mubr.msk.f32.mxu0 %vm312_vm0, %v2102_v34 }
  0x2c   : > { %1732 = vmatmul.mubr.msk.f32.gmra.mrb[10].mxu1 %vm312_vm0, %v2111_v35 }
  0x2d   : > { %1764 = vmatmul.mubr.msk.f32.gmra.mrb[10].mxu0 %vm312_vm0, %v2116_v36  ;;  %1734 = vmatprep.mubr.msk.f32.mxu1 %vm312_vm0, %v2119_v37 }
  0x2e   : > { %1766 = vmatprep.mubr.msk.f32.mxu0 %vm312_vm0, %v2122_v38 }
  0x30   : > { %1735 = vmatmul.mubr.msk.f32.gmra.mrb[12].mxu1 %vm312_vm0, %v2131_v39 }
  0x31   : > { %1767 = vmatmul.mubr.msk.f32.gmra.mrb[12].mxu0 %vm312_vm0, %v2136_v40  ;;  %1737 = vmatprep.mubr.msk.f32.mxu1 %vm312_vm0, %v2139_v41 }
  0x32   : > { %1769 = vmatprep.mubr.msk.f32.mxu0 %vm312_vm0, %v2142_v42 }
  0x34   : > { %1738 = vmatmul.mubr.msk.f32.gmra.mrb[14].mxu1 %vm312_vm0, %v2151_v43 }
  0x35   : > { %1770 = vmatmul.mubr.msk.f32.gmra.mrb[14].mxu0 %vm312_vm0, %v2156_v44 }
  0x82   : > { %v2162_v46 = vpop.permute.xlu0 %833 }
  0xeb   : > { %v1718_v45 = vpop.f32.mrb[0].mxu1 }
  0xec   : > { %v1750_v47 = vpop.f32.mrb[0].mxu0  ;;  %v427_v48 = vpop.f32.mrb[1].mxu1 }
  0xed   : > { %v2164_v49 = vadd.f32 %v1750_v47, %v1718_v45  ;;  %v620_v50 = vpop.f32.mrb[1].mxu0 }
  0xee   : > { %v2166_v51 = vadd.f32 %v620_v50, %v427_v48 }
  0xef   : > { %v1721_v52 = vpop.f32.mrb[2].mxu1  ;;  %v837_v53 = vadd.f32 %v2162_v46, %v2164_v49 }
  0xf0   : > { %v1753_v54 = vpop.f32.mrb[2].mxu0  ;;  %v437_v55 = vpop.f32.mrb[3].mxu1  ;;  %v836_v56 = vadd.f32 %v2162_v46, %v2166_v51 }
  0xf1   : > { %v2172_v57 = vadd.f32 %v1753_v54, %v1721_v52  ;;  %870 = vrot.lane.b32.xlu1 %v837_v53, %s1919_s14  ;;  %v630_v58 = vpop.f32.mrb[3].mxu0 }
  0xf2   : > { %v2175_v59 = vadd.f32 %v630_v58, %v437_v55  ;;  %868 = vrot.lane.b32.xlu0 %v836_v56, %s1919_s14 }
  0xf3   : > { %v839_v60 = vadd.f32 %v2162_v46, %v2172_v57  ;;  %v1724_v61 = vpop.f32.mrb[4].mxu1 }
  0xf4   : > { %v838_v62 = vadd.f32 %v2162_v46, %v2175_v59  ;;  %v1756_v63 = vpop.f32.mrb[4].mxu0  ;;  %v447_v0 = vpop.f32.mrb[5].mxu1 }
  0xf5   : > { %v2182_v1 = vadd.f32 %v1756_v63, %v1724_v61  ;;  %v640_v2 = vpop.f32.mrb[5].mxu0 }
  0xf6   : > { %v2184_v3 = vadd.f32 %v640_v2, %v447_v0  ;;  %872 = vrot.lane.b32.xlu1 %v838_v62, %s1919_s14  ;;  %874 = vrot.lane.b32.xlu0 %v839_v60, %s1919_s14 }
  0xf7   : > { %v841_v4 = vadd.f32 %v2162_v46, %v2182_v1  ;;  %v1727_v5 = vpop.f32.mrb[6].mxu1 }
  0xf8   : > { %v840_v6 = vadd.f32 %v2162_v46, %v2184_v3  ;;  %v1759_v7 = vpop.f32.mrb[6].mxu0  ;;  %v457_v8 = vpop.f32.mrb[7].mxu1 }
  0xf9   : > { %v2192_v9 = vadd.f32 %v1759_v7, %v1727_v5  ;;  %v650_v10 = vpop.f32.mrb[7].mxu0 }
  0xfa   : > { %v2194_v11 = vadd.f32 %v650_v10, %v457_v8  ;;  %876 = vrot.lane.b32.xlu1 %v840_v6, %s1919_s14  ;;  %878 = vrot.lane.b32.xlu0 %v841_v4, %s1919_s14 }
  0xfb   : > { %v843_v12 = vadd.f32 %v2162_v46, %v2192_v9  ;;  %v1730_v45 = vpop.f32.mrb[8].mxu1 }
  0xfc   : > { %v842_v47 = vadd.f32 %v2162_v46, %v2194_v11  ;;  %v1762_v48 = vpop.f32.mrb[8].mxu0  ;;  %v467_v50 = vpop.f32.mrb[9].mxu1 }
  0xfd   : > { %v2202_v52 = vadd.f32 %v1762_v48, %v1730_v45  ;;  %v660_v53 = vpop.f32.mrb[9].mxu0 }
  0xfe   : > { %v2204_v54 = vadd.f32 %v660_v53, %v467_v50  ;;  %880 = vrot.lane.b32.xlu1 %v842_v47, %s1919_s14  ;;  %882 = vrot.lane.b32.xlu0 %v843_v12, %s1919_s14 }
  0xff   : > { %v845_v55 = vadd.f32 %v2162_v46, %v2202_v52  ;;  %v1733_v56 = vpop.f32.mrb[10].mxu1 }
 0x100   : > { %v844_v58 = vadd.f32 %v2162_v46, %v2204_v54  ;;  %v1765_v60 = vpop.f32.mrb[10].mxu0  ;;  %v477_v61 = vpop.f32.mrb[11].mxu1 }
 0x101   : > { %v2212_v62 = vadd.f32 %v1765_v60, %v1733_v56  ;;  %v670_v63 = vpop.f32.mrb[11].mxu0 }
 0x102   : > { %v2214_v0 = vadd.f32 %v670_v63, %v477_v61  ;;  %884 = vrot.lane.b32.xlu1 %v844_v58, %s1919_s14  ;;  %886 = vrot.lane.b32.xlu0 %v845_v55, %s1919_s14  ;;  %v1028_v63 = vsub.f32 %v2006_v14, %v2003_v13  ;;  %v1032_v14 = vsub.f32 %v2042_v22, %v2039_v21 }
 0x103   : > { %v847_v2 = vadd.f32 %v2162_v46, %v2212_v62  ;;  %v1736_v4 = vpop.f32.mrb[12].mxu1  ;;  %v1036_v22 = vsub.f32 %v2082_v30, %v2079_v29  ;;  %v700_v30 = vld [vmem:[%s2284_s26 + $0x8] sm:$0xff] }
 0x104   : > { %v846_v5 = vadd.f32 %v2162_v46, %v2214_v0  ;;  %v1768_v6 = vpop.f32.mrb[12].mxu0  ;;  %v487_v7 = vpop.f32.mrb[13].mxu1 }
 0x105   : > { %v2222_v8 = vadd.f32 %v1768_v6, %v1736_v4  ;;  %v680_v10 = vpop.f32.mrb[13].mxu0  ;;  %v1030_v4 = vsub.f32 %v2022_v18, %v2019_v17  ;;  %v1034_v18 = vsub.f32 %v2062_v26, %v2059_v25  ;;  %v1038_v26 = vsub.f32 %v2102_v34, %v2099_v33  ;;  %v699_v34 = vld [vmem:[%s2284_s26] sm:$0xff] }
 0x106   : > { %v2224_v12 = vadd.f32 %v680_v10, %v487_v7  ;;  %888 = vrot.lane.b32.xlu1 %v846_v5, %s1919_s14  ;;  %890 = vrot.lane.b32.xlu0 %v847_v2, %s1919_s14  ;;  %v1029_v2 = vsub.f32 %v2016_v16, %v2011_v15  ;;  %v1033_v16 = vsub.f32 %v2056_v24, %v2051_v23  ;;  %v701_v10 = vld [vmem:[%s2284_s26 + $0x10] sm:$0xff] }
 0x107   : > { %v849_v45 = vadd.f32 %v2162_v46, %v2222_v8  ;;  %v1739_v47 = vpop.f32.mrb[14].mxu1  ;;  %v1037_v24 = vsub.f32 %v2096_v32, %v2091_v31  ;;  %v2288_v32 = vadd.f32 %v700_v30, %v2164_v49  ;;  %v2293_v5 = vadd.f32 %v699_v34, %v2166_v51 }
 0x108   : > { %v848_v48 = vadd.f32 %v2162_v46, %v2224_v12  ;;  %v1771_v50 = vpop.f32.mrb[14].mxu0  ;;  %v497_v53 = vpop.f32.mrb[15].mxu1 }
 0x109   : > { %v2232_v55 = vadd.f32 %v1771_v50, %v1739_v47  ;;  %v690_v56 = vpop.f32.mrb[15].mxu0  ;;  %v1650_v6 = vmul.f32 -1.442695, %v2288_v32  ;;  %v1649_v47 = vmul.f32 -1.442695, %v2293_v5  ;;  %v703_v50 = vld [vmem:[%s2284_s26 + $0x20] sm:$0xff] }
 0x10a   : > { %v2234_v58 = vadd.f32 %v690_v56, %v497_v53  ;;  %892 = vrot.lane.b32.xlu1 %v848_v48, %s1919_s14  ;;  %894 = vrot.lane.b32.xlu0 %v849_v45, %s1919_s14  ;;  %v704_v45 = vld [vmem:[%s2284_s26 + $0x28] sm:$0xff]  ;;  %v2303_v48 = vadd.f32 %v701_v10, %v2175_v59  ;;  %v706_v53 = vld [vmem:[%s2284_s26 + $0x38] sm:$0xff]  ;;  %v2313_v56 = vadd.f32 %v703_v50, %v2184_v3 }
 0x10b   : > { %v851_v60 = vadd.f32 %v2162_v46, %v2232_v55  ;;  %1815 = vpow2.f32 %v1650_v6  ;;  %v2307_v51 = vadd.f32 %v704_v45, %v2182_v1  ;;  %v714_v50 = vld [vmem:[%s2284_s26 + $0x78] sm:$0xff] }
 0x10c   : > { %v850_v61 = vadd.f32 %v2162_v46, %v2234_v58  ;;  %v1031_v46 = vsub.f32 %v2036_v20, %v2031_v19  ;;  %v1035_v20 = vsub.f32 %v2076_v28, %v2071_v27  ;;  %v1039_v28 = vsub.f32 %v2116_v36, %v2111_v35  ;;  %v702_v36 = vld [vmem:[%s2284_s26 + $0x18] sm:$0xff] }
 0x10d   : > { %v2297_v7 = vadd.f32 %v702_v36, %v2172_v57  ;;  %1817 = vpow2.f32 %v1649_v47  ;;  %v1651_v57 = vmul.f32 -1.442695, %v2303_v48  ;;  %v1654_v59 = vmul.f32 -1.442695, %v2307_v51  ;;  %v711_v36 = vld [vmem:[%s2284_s26 + $0x60] sm:$0xff] }
 0x10e   : > { %896 = vrot.lane.b32.xlu1 %v850_v61, %s1919_s14  ;;  %898 = vrot.lane.b32.xlu0 %v851_v60, %s1919_s14  ;;  %v2317_v60 = vadd.f32 %v706_v53, %v2192_v9  ;;  %v705_v61 = vld [vmem:[%s2284_s26 + $0x30] sm:$0xff]  ;;  %v1653_v1 = vmul.f32 -1.442695, %v2313_v56 }
 0x10f   : > { %v1652_v49 = vmul.f32 -1.442695, %v2297_v7 }
 0x110   : > { %v1656_v3 = vmul.f32 -1.442695, %v2317_v60 }
 0x111   : > { %1819 = vpow2.f32 %v1652_v49 }
 0x112   : > { %1060 = vrot.lane.b32.xlu1 %v1028_v63, %s1920_s23  ;;  %1062 = vrot.lane.b32.xlu0 %v1029_v2, %s1920_s23  ;;  %1821 = vpow2.f32 %v1651_v57  ;;  %v2322_v63 = vadd.f32 %v705_v61, %v2194_v11  ;;  %v708_v2 = vld [vmem:[%s2284_s26 + $0x48] sm:$0xff]  ;;  %v709_v11 = vld [vmem:[%s2284_s26 + $0x50] sm:$0xff] }
 0x113   : > { %1823 = vpow2.f32 %v1654_v59  ;;  %v2342_v30 = vadd.f32 %v709_v11, %v2214_v0  ;;  %v2352_v0 = vadd.f32 %v711_v36, %v2224_v12  ;;  %v713_v57 = vld [vmem:[%s2284_s26 + $0x70] sm:$0xff] }
 0x114   : > { %1825 = vpow2.f32 %v1653_v1  ;;  %v1655_v9 = vmul.f32 -1.442695, %v2322_v63  ;;  %v2362_v12 = vadd.f32 %v713_v57, %v2234_v58 }
 0x115   : > { %1827 = vpow2.f32 %v1656_v3  ;;  %v1659_v49 = vmul.f32 -1.442695, %v2342_v30  ;;  %v1661_v3 = vmul.f32 -1.442695, %v2352_v0 }
 0x116   : > { %1064 = vrot.lane.b32.xlu1 %v1030_v4, %s1920_s23  ;;  %1066 = vrot.lane.b32.xlu0 %v1031_v46, %s1920_s23  ;;  %v707_v4 = vld [vmem:[%s2284_s26 + $0x40] sm:$0xff]  ;;  %v1816_v46 = vpop.eup %1815  ;;  %1829 = vpow2.f32 %v1655_v9 }
 0x11a   : > { %1068 = vrot.lane.b32.xlu1 %v1032_v14, %s1920_s23  ;;  %1070 = vrot.lane.b32.xlu0 %v1033_v16, %s1920_s23  ;;  %v2328_v14 = vadd.f32 %v708_v2, %v2202_v52  ;;  %v2332_v16 = vadd.f32 %v707_v4, %v2204_v54  ;;  %v712_v54 = vld [vmem:[%s2284_s26 + $0x68] sm:$0xff] }
 0x11c   : > { %v1657_v52 = vmul.f32 -1.442695, %v2332_v16 }
 0x11e   : > { %1072 = vrot.lane.b32.xlu1 %v1034_v18, %s1920_s23  ;;  %1074 = vrot.lane.b32.xlu0 %v1035_v20, %s1920_s23  ;;  %v710_v18 = vld [vmem:[%s2284_s26 + $0x58] sm:$0xff]  ;;  %v1818_v20 = vpop.eup %1817 }
 0x11f   : > { %v779_v34 = vadd.f32 1.0, %v1818_v20 }
 0x122   : > { %1076 = vrot.lane.b32.xlu1 %v1036_v22, %s1920_s23  ;;  %1078 = vrot.lane.b32.xlu0 %v1037_v24, %s1920_s23  ;;  %v780_v22 = vadd.f32 1.0, %v1816_v46  ;;  %v1820_v24 = vpop.eup %1819 }
 0x123   : > { %v1822_v6 = vpop.eup %1821  ;;  %v782_v10 = vadd.f32 1.0, %v1820_v24 }
 0x124   : > { %1831 = vrcp.f32 %v780_v22  ;;  %v1824_v45 = vpop.eup %1823  ;;  %v781_v53 = vadd.f32 1.0, %v1822_v6 }
 0x125   : > { %v1826_v59 = vpop.eup %1825  ;;  %v784_v61 = vadd.f32 1.0, %v1824_v45 }
 0x126   : > { %1080 = vrot.lane.b32.xlu1 %v1038_v26, %s1920_s23  ;;  %1082 = vrot.lane.b32.xlu0 %v1039_v28, %s1920_s23  ;;  %v1658_v26 = vmul.f32 -1.442695, %v2328_v14  ;;  %v2338_v28 = vadd.f32 %v710_v18, %v2212_v62  ;;  %v2348_v62 = vadd.f32 %v712_v54, %v2222_v8  ;;  %v1828_v1 = vpop.eup %1827  ;;  %v2358_v8 = vadd.f32 %v714_v50, %v2232_v55 }
 0x127   : > { %v783_v4 = vadd.f32 1.0, %v1826_v59  ;;  %v1830_v46 = vpop.eup %1829  ;;  %v786_v9 = vadd.f32 1.0, %v1828_v1  ;;  %v1663_v55 = vmul.f32 -1.442695, %v2362_v12 }
 0x128   : > { %1833 = vpow2.f32 %v1658_v26  ;;  %v1660_v47 = vmul.f32 -1.442695, %v2338_v28  ;;  %v1662_v2 = vmul.f32 -1.442695, %v2348_v62  ;;  %v1664_v18 = vmul.f32 -1.442695, %v2358_v8 }
 0x129   : > { %1835 = vpow2.f32 %v1657_v52  ;;  %v785_v22 = vadd.f32 1.0, %v1830_v46 }
 0x12a   : > { %1837 = vrcp.f32 %v779_v34 }
 0x12b   : > { %1839 = vrcp.f32 %v782_v10 }
 0x12c   : > { %1841 = vpow2.f32 %v1660_v47 }
 0x12d   : > { %1843 = vpow2.f32 %v1659_v49 }
 0x12e   : > { %1845 = vrcp.f32 %v781_v53  ;;  %v2365_v11 = vpop.eup %1831 }
 0x12f   : > { %1847 = vrcp.f32 %v784_v61 }
 0x130   : > { %1849 = vpow2.f32 %v1662_v2 }
 0x131   : > { %1851 = vpow2.f32 %v1661_v3 }
 0x132   : > { %v1834_v20 = vpop.eup %1833  ;;  %1853 = vrcp.f32 %v783_v4 }
 0x133   : > { %v1836_v24 = vpop.eup %1835  ;;  %1855 = vrcp.f32 %v786_v9  ;;  %v788_v36 = vadd.f32 1.0, %v1834_v20 }
 0x134   : > { %v2368_v26 = vpop.eup %1837  ;;  %1857 = vpow2.f32 %v1664_v18  ;;  %v787_v45 = vadd.f32 1.0, %v1836_v24 }
 0x135   : > { %v2371_v34 = vpop.eup %1839  ;;  %1859 = vpow2.f32 %v1663_v55 }
 0x136   : > { %v1842_v10 = vpop.eup %1841  ;;  %1861 = vrcp.f32 %v785_v22 }
 0x137   : > { %v1844_v47 = vpop.eup %1843  ;;  %1863 = vrcp.f32 %v788_v36  ;;  %v790_v59 = vadd.f32 1.0, %v1842_v10 }
 0x138   : > { %v2376_v49 = vpop.eup %1845  ;;  %1865 = vrcp.f32 %v787_v45  ;;  %v789_v3 = vadd.f32 1.0, %v1844_v47 }
 0x139   : > { %2709 = vst [vmem:[#allocation2_spill] sm:$0xff] %v2376_v49  ;;  %v2378_v57 = vpop.eup %1847  ;;  %1867 = vrcp.f32 %v790_v59 }
 0x13a   : > { %2710 = vst [vmem:[#allocation3_spill] sm:$0xff] %v2378_v57  ;;  %v1850_v2 = vpop.eup %1849  ;;  %1869 = vrcp.f32 %v789_v3 }
 0x13b   : > { %v1852_v4 = vpop.eup %1851  ;;  %v792_v20 = vadd.f32 1.0, %v1850_v2 }
 0x13c   : > { %v2384_v46 = vpop.eup %1853 }
 0x13d   : > { %2711 = vst [vmem:[#allocation4_spill] sm:$0xff] %v2384_v46  ;;  %v2386_v55 = vpop.eup %1855  ;;  %1871 = vrcp.f32 %v792_v20 }
 0x13e   : > { %2712 = vst [vmem:[#allocation5_spill] sm:$0xff] %v2386_v55 }
 0x163   : > { %v871_v58 = vpop.permute.xlu1 %870 }
 0x164   : > { %v917_v52 = vmul.f32 %v2365_v11, %v871_v58  ;;  %v869_v54 = vpop.permute.xlu0 %868  ;;  %v1858_v58 = vpop.eup %1857 }
 0x165   : > { %v916_v6 = vmul.f32 %v2368_v26, %v869_v54  ;;  %v1860_v54 = vpop.eup %1859  ;;  %v794_v45 = vadd.f32 1.0, %v1858_v58 }
 0x166   : > { %950 = vrot.lane.b32.xlu0 %v917_v52, %s1919_s14  ;;  %v791_v52 = vadd.f32 1.0, %v1852_v4  ;;  %v2392_v36 = vpop.eup %1861 }
 0x167   : > { %948 = vrot.lane.b32.xlu1 %v916_v6, %s1919_s14  ;;  %2713 = vst [vmem:[#allocation6_spill] sm:$0xff] %v2392_v36  ;;  %v2396_v59 = vpop.eup %1863 }
 0x168   : > { %v873_v50 = vpop.permute.xlu1 %872  ;;  %v875_v53 = vpop.permute.xlu0 %874  ;;  %1873 = vrcp.f32 %v791_v52  ;;  %2714 = vst [vmem:[#allocation7_spill] sm:$0xff] %v2396_v59 }
 0x169   : > { %v918_v61 = vmul.f32 %v2376_v49, %v873_v50  ;;  %v919_v1 = vmul.f32 %v2371_v34, %v875_v53  ;;  %v793_v53 = vadd.f32 1.0, %v1860_v54  ;;  %1875 = vrcp.f32 %v794_v45 }
 0x16b   : > { %954 = vrot.lane.b32.xlu0 %v919_v1, %s1919_s14  ;;  %952 = vrot.lane.b32.xlu1 %v918_v61, %s1919_s14  ;;  %v2400_v61 = vpop.eup %1865  ;;  %1877 = vrcp.f32 %v793_v53 }
 0x16c   : > { %v877_v9 = vpop.permute.xlu1 %876  ;;  %v879_v18 = vpop.permute.xlu0 %878  ;;  %2715 = vst [vmem:[#allocation8_spill] sm:$0xff] %v2400_v61 }
 0x16d   : > { %v920_v22 = vmul.f32 %v2384_v46, %v877_v9  ;;  %v921_v24 = vmul.f32 %v2378_v57, %v879_v18  ;;  %v2404_v9 = vpop.eup %1867 }
 0x16e   : > { %2716 = vst [vmem:[#allocation9_spill] sm:$0xff] %v2404_v9  ;;  %v2408_v18 = vpop.eup %1869 }
 0x16f   : > { %958 = vrot.lane.b32.xlu0 %v921_v24, %s1919_s14  ;;  %956 = vrot.lane.b32.xlu1 %v920_v22, %s1919_s14  ;;  %2717 = vst [vmem:[#allocation10_spill] sm:$0xff] %v2408_v18  ;;  %v2412_v52 = vpop.eup %1871 }
 0x170   : > { %v881_v6 = vpop.permute.xlu1 %880  ;;  %v883_v10 = vpop.permute.xlu0 %882 }
 0x171   : > { %v922_v47 = vmul.f32 %v2392_v36, %v881_v6  ;;  %v923_v50 = vmul.f32 %v2386_v55, %v883_v10 }
 0x172   : > { %v2416_v54 = vpop.eup %1873 }
 0x173   : > { %962 = vrot.lane.b32.xlu0 %v923_v50, %s1919_s14  ;;  %960 = vrot.lane.b32.xlu1 %v922_v47, %s1919_s14  ;;  %v2420_v50 = vpop.eup %1875 }
 0x174   : > { %v885_v1 = vpop.permute.xlu1 %884  ;;  %v887_v2 = vpop.permute.xlu0 %886 }
 0x175   : > { %v924_v3 = vmul.f32 %v2400_v61, %v885_v1  ;;  %v925_v4 = vmul.f32 %v2396_v59, %v887_v2  ;;  %v2424_v53 = vpop.eup %1877 }
 0x177   : > { %966 = vrot.lane.b32.xlu0 %v925_v4, %s1919_s14  ;;  %964 = vrot.lane.b32.xlu1 %v924_v3, %s1919_s14 }
 0x178   : > { %v889_v20 = vpop.permute.xlu1 %888  ;;  %v891_v22 = vpop.permute.xlu0 %890 }
 0x179   : > { %v926_v24 = vmul.f32 %v2408_v18, %v889_v20  ;;  %v927_v58 = vmul.f32 %v2404_v9, %v891_v22  ;;  %v1041_v20 = vsub.f32 %v2136_v40, %v2131_v39  ;;  %v1040_v22 = vsub.f32 %v2122_v38, %v2119_v37 }
 0x17b   : > { %970 = vrot.lane.b32.xlu0 %v927_v58, %s1919_s14  ;;  %968 = vrot.lane.b32.xlu1 %v926_v24, %s1919_s14 }
 0x17c   : > { %v893_v6 = vpop.permute.xlu1 %892  ;;  %v895_v10 = vpop.permute.xlu0 %894 }
 0x17d   : > { %v928_v45 = vmul.f32 %v2416_v54, %v893_v6  ;;  %v929_v47 = vmul.f32 %v2412_v52, %v895_v10  ;;  %v1043_v6 = vsub.f32 %v2156_v44, %v2151_v43  ;;  %v1042_v10 = vsub.f32 %v2142_v42, %v2139_v41 }
 0x17f   : > { %974 = vrot.lane.b32.xlu0 %v929_v47, %s1919_s14  ;;  %972 = vrot.lane.b32.xlu1 %v928_v45, %s1919_s14 }
 0x180   : > { %v897_v1 = vpop.permute.xlu1 %896  ;;  %v899_v2 = vpop.permute.xlu0 %898 }
 0x181   : > { %v930_v3 = vmul.f32 %v2424_v53, %v897_v1  ;;  %v931_v4 = vmul.f32 %v2420_v50, %v899_v2 }
 0x183   : > { %978 = vrot.lane.b32.xlu0 %v931_v4, %s1919_s14  ;;  %976 = vrot.lane.b32.xlu1 %v930_v3, %s1919_s14 }
 0x184   : > { %v1061_v24 = vpop.permute.xlu1 %1060  ;;  %v1063_v58 = vpop.permute.xlu0 %1062 }
 0x185   : > { %v1108_v1 = vmul.f32 %v2368_v26, %v1061_v24  ;;  %v1109_v2 = vmul.f32 %v2365_v11, %v1063_v58 }
 0x187   : > { %1086 = vrot.lane.b32.xlu0 %v1041_v20, %s1920_s23  ;;  %1084 = vrot.lane.b32.xlu1 %v1040_v22, %s1920_s23 }
 0x188   : > { %v1065_v45 = vpop.permute.xlu1 %1064  ;;  %v1067_v47 = vpop.permute.xlu0 %1066 }
 0x189   : > { %v1110_v44 = vmul.f32 %v2376_v49, %v1065_v45  ;;  %v1111_v42 = vmul.f32 %v2371_v34, %v1067_v47 }
 0x18b   : > { %1090 = vrot.lane.b32.xlu0 %v1043_v6, %s1920_s23  ;;  %1088 = vrot.lane.b32.xlu1 %v1042_v10, %s1920_s23 }
 0x18c   : > { %v1069_v40 = vpop.permute.xlu1 %1068  ;;  %v1071_v38 = vpop.permute.xlu0 %1070 }
 0x18d   : > { %v1112_v20 = vmul.f32 %v2384_v46, %v1069_v40  ;;  %v1113_v22 = vmul.f32 %v2378_v57, %v1071_v38 }
 0x18f   : > { %1142 = vrot.lane.b32.xlu0 %v1109_v2, %s1921_s27  ;;  %1140 = vrot.lane.b32.xlu1 %v1108_v1, %s1921_s27 }
 0x190   : > { %v1073_v3 = vpop.permute.xlu1 %1072  ;;  %v1075_v4 = vpop.permute.xlu0 %1074 }
 0x191   : > { %v1114_v6 = vmul.f32 %v2392_v36, %v1073_v3  ;;  %v1115_v10 = vmul.f32 %v2386_v55, %v1075_v4 }
 0x193   : > { %1146 = vrot.lane.b32.xlu0 %v1111_v42, %s1921_s27  ;;  %1144 = vrot.lane.b32.xlu1 %v1110_v44, %s1921_s27 }
 0x194   : > { %v1077_v24 = vpop.permute.xlu1 %1076  ;;  %v1079_v58 = vpop.permute.xlu0 %1078 }
 0x195   : > { %v1116_v45 = vmul.f32 %v2400_v61, %v1077_v24  ;;  %v1117_v47 = vmul.f32 %v2396_v59, %v1079_v58 }
 0x197   : > { %1150 = vrot.lane.b32.xlu0 %v1113_v22, %s1921_s27  ;;  %1148 = vrot.lane.b32.xlu1 %v1112_v20, %s1921_s27 }
 0x198   : > { %v1081_v40 = vpop.permute.xlu1 %1080  ;;  %v1083_v38 = vpop.permute.xlu0 %1082 }
 0x199   : > { %v1118_v1 = vmul.f32 %v2408_v18, %v1081_v40  ;;  %v1119_v2 = vmul.f32 %v2404_v9, %v1083_v38 }
 0x19b   : > { %1154 = vrot.lane.b32.xlu0 %v1115_v10, %s1921_s27  ;;  %1152 = vrot.lane.b32.xlu1 %v1114_v6, %s1921_s27 }
 0x19f   : > { %1158 = vrot.lane.b32.xlu0 %v1117_v47, %s1921_s27  ;;  %1156 = vrot.lane.b32.xlu1 %v1116_v45, %s1921_s27 }
 0x1a3   : > { %1162 = vrot.lane.b32.xlu0 %v1119_v2, %s1921_s27  ;;  %1160 = vrot.lane.b32.xlu1 %v1118_v1, %s1921_s27 }
 0x1d8   : > { %v951_v44 = vpop.permute.xlu0 %950 }
 0x1d9   : > { %v949_v42 = vpop.permute.xlu1 %948  ;;  %v997_v38 = vsub.f32 %v2288_v32, %v951_v44 }
 0x1da   : > { %v996_v2 = vsub.f32 %v2293_v5, %v949_v42 }
 0x1db   : > { %1879 = vtanh.f32 %v997_v38 }
 0x1dc   : > { %1881 = vtanh.f32 %v996_v2 }
 0x1dd   : > { %v955_v3 = vpop.permute.xlu0 %954  ;;  %v953_v4 = vpop.permute.xlu1 %952 }
 0x1de   : > { %v999_v9 = vsub.f32 %v2297_v7, %v955_v3  ;;  %v998_v59 = vsub.f32 %v2303_v48, %v953_v4 }
 0x1e0   : > { %1883 = vtanh.f32 %v999_v9 }
 0x1e1   : > { %v959_v20 = vpop.permute.xlu0 %958  ;;  %v957_v22 = vpop.permute.xlu1 %956  ;;  %1885 = vtanh.f32 %v998_v59 }
 0x1e2   : > { %v1001_v49 = vsub.f32 %v2307_v51, %v959_v20  ;;  %v1000_v32 = vsub.f32 %v2313_v56, %v957_v22 }
 0x1e4   : > { %1887 = vtanh.f32 %v1001_v49 }
 0x1e5   : > { %v963_v24 = vpop.permute.xlu0 %962  ;;  %v961_v58 = vpop.permute.xlu1 %960  ;;  %1889 = vtanh.f32 %v1000_v32 }
 0x1e6   : > { %v1002_v51 = vsub.f32 %v2322_v63, %v961_v58 }
 0x1e9   : > { %v967_v6 = vpop.permute.xlu0 %966  ;;  %v965_v10 = vpop.permute.xlu1 %964 }
 0x1ea   : > { %v1005_v56 = vsub.f32 %v2328_v14, %v967_v6 }
 0x1ed   : > { %v971_v47 = vpop.permute.xlu0 %970  ;;  %v969_v45 = vpop.permute.xlu1 %968 }
 0x1ee   : > { %v1007_v63 = vsub.f32 %v2338_v28, %v971_v47  ;;  %v1006_v14 = vsub.f32 %v2342_v30, %v969_v45 }
 0x1f1   : > { %v975_v61 = vpop.permute.xlu0 %974  ;;  %v973_v40 = vpop.permute.xlu1 %972 }
 0x1f2   : > { %v1008_v28 = vsub.f32 %v2352_v0, %v973_v40 }
 0x1f5   : > { %v979_v18 = vpop.permute.xlu0 %978  ;;  %v977_v1 = vpop.permute.xlu1 %976 }
 0x1f6   : > { %v1011_v30 = vsub.f32 %v2358_v8, %v979_v18 }
 0x1f9   : > { %v1087_v36 = vpop.permute.xlu0 %1086  ;;  %v1085_v55 = vpop.permute.xlu1 %1084 }
 0x1fa   : > { %v1121_v46 = vmul.f32 %v2412_v52, %v1087_v36  ;;  %v1120_v57 = vmul.f32 %v2416_v54, %v1085_v55  ;;  %v1003_v36 = vsub.f32 %v2317_v60, %v963_v24  ;;  %v1004_v60 = vsub.f32 %v2332_v16, %v965_v10 }
 0x1fb   : > { %v1009_v16 = vsub.f32 %v2348_v62, %v975_v61  ;;  %v1010_v62 = vsub.f32 %v2362_v12, %v977_v1 }
 0x1fc   : > { %1166 = vrot.lane.b32.xlu0 %v1121_v46, %s1921_s27  ;;  %1164 = vrot.lane.b32.xlu1 %v1120_v57, %s1921_s27  ;;  %v2482_v57 = vpop.eup %1879  ;;  %1891 = vtanh.f32 %v1003_v36 }
 0x1fd   : > { %v1091_v5 = vpop.permute.xlu0 %1090  ;;  %v1089_v7 = vpop.permute.xlu1 %1088  ;;  %1893 = vtanh.f32 %v1002_v51 }
 0x1fe   : > { %v1123_v48 = vmul.f32 %v2420_v50, %v1091_v5  ;;  %v1122_v44 = vmul.f32 %v2424_v53, %v1089_v7  ;;  %v2484_v46 = vpop.eup %1881  ;;  %1895 = vtanh.f32 %v1005_v56 }
 0x1ff   : > { %v2492_v49 = vpop.eup %1883  ;;  %1897 = vtanh.f32 %v1004_v60 }
 0x200   : > { %1170 = vrot.lane.b32.xlu0 %v1123_v48, %s1921_s27  ;;  %1168 = vrot.lane.b32.xlu1 %v1122_v44, %s1921_s27  ;;  %v2494_v55 = vpop.eup %1885  ;;  %1899 = vtanh.f32 %v1007_v63 }
 0x201   : > { %v2502_v59 = vpop.eup %1887  ;;  %1901 = vtanh.f32 %v1006_v14  ;;  %v1143_v24 = vpop.permute.xlu0 %1142 }
 0x202   : > { %v2504_v9 = vpop.eup %1889  ;;  %1903 = vtanh.f32 %v1009_v16  ;;  %v1141_v58 = vpop.permute.xlu1 %1140  ;;  %v1189_v51 = vadd.f32 %v1143_v24, %v2011_v15 }
 0x203   : > { %1905 = vtanh.f32 %v1008_v28  ;;  %v1188_v56 = vadd.f32 %v1141_v58, %v2003_v13 }
 0x204   : > { %1222 = vrot.lane.b32.xlu0 %v2482_v57, %s1919_s14  ;;  %1220 = vrot.lane.b32.xlu1 %v2484_v46, %s1919_s14  ;;  %1907 = vtanh.f32 %v1011_v30 }
 0x205   : > { %1909 = vtanh.f32 %v1010_v62  ;;  %v1147_v6 = vpop.permute.xlu0 %1146 }
 0x206   : > { %v2512_v42 = vpop.eup %1891  ;;  %v1145_v10 = vpop.permute.xlu1 %1144  ;;  %v1191_v28 = vadd.f32 %v1147_v6, %v2031_v19 }
 0x207   : > { %v2514_v3 = vpop.eup %1893  ;;  %v1190_v30 = vadd.f32 %v1145_v10, %v2019_v17 }
 0x208   : > { %1226 = vrot.lane.b32.xlu0 %v2492_v49, %s1919_s14  ;;  %1224 = vrot.lane.b32.xlu1 %v2494_v55, %s1919_s14  ;;  %v2522_v61 = vpop.eup %1895 }
 0x209   : > { %v2524_v4 = vpop.eup %1897  ;;  %v1151_v47 = vpop.permute.xlu0 %1150 }
 0x20a   : > { %v2530_v0 = vpop.eup %1899  ;;  %v1149_v45 = vpop.permute.xlu1 %1148  ;;  %v1193_v15 = vadd.f32 %v1151_v47, %v2051_v23 }
 0x20b   : > { %v2532_v8 = vpop.eup %1901  ;;  %v1192_v13 = vadd.f32 %v1149_v45, %v2039_v21 }
 0x20c   : > { %1230 = vrot.lane.b32.xlu0 %v2502_v59, %s1919_s14  ;;  %1228 = vrot.lane.b32.xlu1 %v2504_v9, %s1919_s14  ;;  %v2538_v12 = vpop.eup %1903 }
 0x20d   : > { %v2540_v18 = vpop.eup %1905  ;;  %v1155_v40 = vpop.permute.xlu0 %1154 }
 0x20e   : > { %2718 = vst [vmem:[#allocation11_spill] sm:$0xff] %v2540_v18  ;;  %v2546_v20 = vpop.eup %1907  ;;  %v1153_v38 = vpop.permute.xlu1 %1152  ;;  %v1195_v6 = vadd.f32 %v1155_v40, %v2071_v27 }
 0x20f   : > { %2719 = vst [vmem:[#allocation12_spill] sm:$0xff] %v2546_v20  ;;  %v2548_v22 = vpop.eup %1909  ;;  %v1194_v10 = vadd.f32 %v1153_v38, %v2059_v25 }
 0x210   : > { %1234 = vrot.lane.b32.xlu0 %v2512_v42, %s1919_s14  ;;  %1232 = vrot.lane.b32.xlu1 %v2514_v3, %s1919_s14  ;;  %2720 = vst [vmem:[#allocation13_spill] sm:$0xff] %v2548_v22 }
 0x211   : > { %v1159_v2 = vpop.permute.xlu0 %1158 }
 0x212   : > { %v1157_v1 = vpop.permute.xlu1 %1156 }
 0x214   : > { %1238 = vrot.lane.b32.xlu0 %v2522_v61, %s1919_s14  ;;  %1236 = vrot.lane.b32.xlu1 %v2524_v4, %s1919_s14 }
 0x215   : > { %v1163_v32 = vpop.permute.xlu0 %1162 }
 0x216   : > { %v1161_v5 = vpop.permute.xlu1 %1160  ;;  %v1199_v38 = vadd.f32 %v1163_v32, %v2111_v35 }
 0x218   : > { %1242 = vrot.lane.b32.xlu0 %v2530_v0, %s1919_s14  ;;  %1240 = vrot.lane.b32.xlu1 %v2532_v8, %s1919_s14 }
 0x21c   : > { %1246 = vrot.lane.b32.xlu0 %v2538_v12, %s1919_s14  ;;  %1244 = vrot.lane.b32.xlu1 %v2540_v18, %s1919_s14 }
 0x220   : > { %1250 = vrot.lane.b32.xlu0 %v2546_v20, %s1919_s14  ;;  %1248 = vrot.lane.b32.xlu1 %v2548_v22, %s1919_s14 }
 0x26e   : > { %v1167_v7 = vpop.permute.xlu0 %1166  ;;  %v1165_v48 = vpop.permute.xlu1 %1164 }
 0x272   : > { %v1171_v44 = vpop.permute.xlu0 %1170  ;;  %v1169_v36 = vpop.permute.xlu1 %1168 }
 0x276   : > { %v1223_v60 = vpop.permute.xlu0 %1222  ;;  %v1221_v63 = vpop.permute.xlu1 %1220 }
 0x277   : > { %v1269_v14 = vsub.f32 %v1189_v51, %v1223_v60  ;;  %v1268_v16 = vsub.f32 %v1188_v56, %v1221_v63  ;;  %v1198_v51 = vadd.f32 %v1161_v5, %v2099_v33  ;;  %v1200_v60 = vadd.f32 %v1165_v48, %v2119_v37 }
 0x278   : > { %v1203_v5 = vadd.f32 %v1171_v44, %v2151_v43 }
 0x279   : > { %1302 = vrot.lane.b32.xlu0 %v1269_v14, %s1921_s27  ;;  %1300 = vrot.lane.b32.xlu1 %v1268_v16, %s1921_s27  ;;  %v1202_v14 = vadd.f32 %v1169_v36, %v2139_v41 }
 0x27a   : > { %v1227_v62 = vpop.permute.xlu0 %1226  ;;  %v1225_v22 = vpop.permute.xlu1 %1224 }
 0x27b   : > { %v1271_v20 = vsub.f32 %v1191_v28, %v1227_v62  ;;  %v1270_v18 = vsub.f32 %v1190_v30, %v1225_v22  ;;  %v2721_v62 = vld [vmem:[#allocation2_spill] sm:$0xff] }
 0x27d   : > { %1306 = vrot.lane.b32.xlu0 %v1271_v20, %s1921_s27  ;;  %1304 = vrot.lane.b32.xlu1 %v1270_v18, %s1921_s27  ;;  %v1197_v20 = vadd.f32 %v1159_v2, %v2091_v31  ;;  %v1196_v18 = vadd.f32 %v1157_v1, %v2079_v29  ;;  %v1201_v1 = vadd.f32 %v1167_v7, %v2131_v39 }
 0x27e   : > { %v1231_v24 = vpop.permute.xlu0 %1230  ;;  %v1229_v19 = vpop.permute.xlu1 %1228 }
 0x27f   : > { %v1273_v58 = vsub.f32 %v1193_v15, %v1231_v24  ;;  %v1272_v17 = vsub.f32 %v1192_v13, %v1229_v19  ;;  %v2722_v19 = vld [vmem:[#allocation3_spill] sm:$0xff] }
 0x281   : > { %1310 = vrot.lane.b32.xlu0 %v1273_v58, %s1921_s27  ;;  %1308 = vrot.lane.b32.xlu1 %v1272_v17, %s1921_s27  ;;  %v2723_v58 = vld [vmem:[#allocation4_spill] sm:$0xff] }
 0x282   : > { %v1235_v22 = vpop.permute.xlu0 %1234  ;;  %v1233_v23 = vpop.permute.xlu1 %1232 }
 0x283   : > { %v1275_v47 = vsub.f32 %v1195_v6, %v1235_v22  ;;  %v1274_v21 = vsub.f32 %v1194_v10, %v1233_v23  ;;  %v2724_v10 = vld [vmem:[#allocation5_spill] sm:$0xff]  ;;  %v2725_v22 = vld [vmem:[#allocation6_spill] sm:$0xff] }
 0x285   : > { %1314 = vrot.lane.b32.xlu0 %v1275_v47, %s1921_s27  ;;  %1312 = vrot.lane.b32.xlu1 %v1274_v21, %s1921_s27 }
 0x286   : > { %v1239_v45 = vpop.permute.xlu0 %1238  ;;  %v1237_v27 = vpop.permute.xlu1 %1236 }
 0x287   : > { %v1277_v40 = vsub.f32 %v1197_v20, %v1239_v45  ;;  %v1276_v25 = vsub.f32 %v1196_v18, %v1237_v27  ;;  %v2726_v20 = vld [vmem:[#allocation7_spill] sm:$0xff]  ;;  %v2727_v45 = vld [vmem:[#allocation8_spill] sm:$0xff] }
 0x289   : > { %1318 = vrot.lane.b32.xlu0 %v1277_v40, %s1921_s27  ;;  %1316 = vrot.lane.b32.xlu1 %v1276_v25, %s1921_s27 }
 0x28a   : > { %v1243_v56 = vpop.permute.xlu0 %1242  ;;  %v1241_v31 = vpop.permute.xlu1 %1240 }
 0x28b   : > { %v1279_v2 = vsub.f32 %v1199_v38, %v1243_v56  ;;  %v1278_v29 = vsub.f32 %v1198_v51, %v1241_v31  ;;  %v2728_v38 = vld [vmem:[#allocation9_spill] sm:$0xff]  ;;  %v2729_v56 = vld [vmem:[#allocation10_spill] sm:$0xff] }
 0x28d   : > { %1322 = vrot.lane.b32.xlu0 %v1279_v2, %s1921_s27  ;;  %1320 = vrot.lane.b32.xlu1 %v1278_v29, %s1921_s27 }
 0x28e   : > { %v1247_v63 = vpop.permute.xlu0 %1246  ;;  %v1245_v35 = vpop.permute.xlu1 %1244 }
 0x28f   : > { %v1281_v32 = vsub.f32 %v1201_v1, %v1247_v63  ;;  %v1280_v33 = vsub.f32 %v1200_v60, %v1245_v35 }
 0x291   : > { %1326 = vrot.lane.b32.xlu0 %v1281_v32, %s1921_s27  ;;  %1324 = vrot.lane.b32.xlu1 %v1280_v33, %s1921_s27 }
 0x292   : > { %v1251_v16 = vpop.permute.xlu0 %1250  ;;  %v1249_v39 = vpop.permute.xlu1 %1248 }
 0x293   : > { %v1283_v7 = vsub.f32 %v1203_v5, %v1251_v16  ;;  %v1282_v37 = vsub.f32 %v1202_v14, %v1249_v39 }
 0x295   : > { %1330 = vrot.lane.b32.xlu0 %v1283_v7, %s1921_s27  ;;  %1328 = vrot.lane.b32.xlu1 %v1282_v37, %s1921_s27 }
 0x2eb   : > { %v1303_v48 = vpop.permute.xlu0 %1302  ;;  %v1301_v28 = vpop.permute.xlu1 %1300 }
 0x2ec   : > { %v1349_v30 = vmul.f32 %v2365_v11, %v1303_v48  ;;  %v1348_v43 = vmul.f32 %v2368_v26, %v1301_v28 }
 0x2ee   : > { %1382 = vrot.lane.b32.xlu0 %v1349_v30, %s1921_s27  ;;  %1380 = vrot.lane.b32.xlu1 %v1348_v43, %s1921_s27 }
 0x2ef   : > { %v1307_v41 = vpop.permute.xlu0 %1306  ;;  %v1305_v44 = vpop.permute.xlu1 %1304 }
 0x2f0   : > { %v1351_v36 = vmul.f32 %v2371_v34, %v1307_v41  ;;  %v1350_v15 = vmul.f32 %v2721_v62, %v1305_v44 }
 0x2f2   : > { %1386 = vrot.lane.b32.xlu0 %v1351_v36, %s1921_s27  ;;  %1384 = vrot.lane.b32.xlu1 %v1350_v15, %s1921_s27 }
 0x2f3   : > { %v1311_v13 = vpop.permute.xlu0 %1310  ;;  %v1309_v24 = vpop.permute.xlu1 %1308 }
 0x2f4   : > { %v1353_v11 = vmul.f32 %v2722_v19, %v1311_v13  ;;  %v1352_v26 = vmul.f32 %v2723_v58, %v1309_v24 }
 0x2f6   : > { %1390 = vrot.lane.b32.xlu0 %v1353_v11, %s1921_s27  ;;  %1388 = vrot.lane.b32.xlu1 %v1352_v26, %s1921_s27  ;;  %v2732_v11 = vld [vmem:[#allocation13_spill] sm:$0xff] }
 0x2f7   : > { %v1315_v17 = vpop.permute.xlu0 %1314  ;;  %v1313_v6 = vpop.permute.xlu1 %1312 }
 0x2f8   : > { %v1355_v34 = vmul.f32 %v2724_v10, %v1315_v17  ;;  %v1354_v23 = vmul.f32 %v2725_v22, %v1313_v6 }
 0x2fa   : > { %1394 = vrot.lane.b32.xlu0 %v1355_v34, %s1921_s27  ;;  %1392 = vrot.lane.b32.xlu1 %v1354_v23, %s1921_s27 }
 0x2fb   : > { %v1319_v47 = vpop.permute.xlu0 %1318  ;;  %v1317_v21 = vpop.permute.xlu1 %1316 }
 0x2fc   : > { %v1357_v18 = vmul.f32 %v2726_v20, %v1319_v47  ;;  %v1356_v27 = vmul.f32 %v2727_v45, %v1317_v21 }
 0x2fe   : > { %1398 = vrot.lane.b32.xlu0 %v1357_v18, %s1921_s27  ;;  %1396 = vrot.lane.b32.xlu1 %v1356_v27, %s1921_s27 }
 0x2ff   : > { %v1323_v40 = vpop.permute.xlu0 %1322  ;;  %v1321_v25 = vpop.permute.xlu1 %1320 }
 0x300   : > { %v1359_v51 = vmul.f32 %v2728_v38, %v1323_v40  ;;  %v1358_v31 = vmul.f32 %v2729_v56, %v1321_v25 }
 0x302   : > { %1402 = vrot.lane.b32.xlu0 %v1359_v51, %s1921_s27  ;;  %1400 = vrot.lane.b32.xlu1 %v1358_v31, %s1921_s27 }
 0x303   : > { %v1327_v2 = vpop.permute.xlu0 %1326  ;;  %v1325_v29 = vpop.permute.xlu1 %1324 }
 0x304   : > { %v1361_v1 = vmul.f32 %v2412_v52, %v1327_v2  ;;  %v1360_v60 = vmul.f32 %v2416_v54, %v1325_v29 }
 0x306   : > { %1406 = vrot.lane.b32.xlu0 %v1361_v1, %s1921_s27  ;;  %1404 = vrot.lane.b32.xlu1 %v1360_v60, %s1921_s27 }
 0x307   : > { %v1331_v63 = vpop.permute.xlu0 %1330  ;;  %v1329_v35 = vpop.permute.xlu1 %1328 }
 0x308   : > { %v1363_v32 = vmul.f32 %v2420_v50, %v1331_v63  ;;  %v1362_v33 = vmul.f32 %v2424_v53, %v1329_v35 }
 0x30a   : > { %1410 = vrot.lane.b32.xlu0 %v1363_v32, %s1921_s27  ;;  %1408 = vrot.lane.b32.xlu1 %v1362_v33, %s1921_s27 }
 0x360   : > { %v1383_v5 = vpop.permute.xlu0 %1382  ;;  %v1381_v14 = vpop.permute.xlu1 %1380 }
 0x361   : > { %v1429_v52 = vadd.f32 %v2482_v57, %v1383_v5  ;;  %v1428_v54 = vadd.f32 %v2484_v46, %v1381_v14 }
 0x363   : > { %1462 = vrot.lane.b32.xlu0 %v1429_v52, %s1919_s14  ;;  %1460 = vrot.lane.b32.xlu1 %v1428_v54, %s1919_s14 }
 0x364   : > { %v1387_v16 = vpop.permute.xlu0 %1386  ;;  %v1385_v39 = vpop.permute.xlu1 %1384 }
 0x365   : > { %v1431_v50 = vadd.f32 %v2492_v49, %v1387_v16  ;;  %v1430_v53 = vadd.f32 %v2494_v55, %v1385_v39 }
 0x367   : > { %1466 = vrot.lane.b32.xlu0 %v1431_v50, %s1919_s14  ;;  %1464 = vrot.lane.b32.xlu1 %v1430_v53, %s1919_s14 }
 0x368   : > { %v1391_v7 = vpop.permute.xlu0 %1390  ;;  %v1389_v37 = vpop.permute.xlu1 %1388 }
 0x369   : > { %v1433_v57 = vadd.f32 %v2502_v59, %v1391_v7  ;;  %v1432_v46 = vadd.f32 %v2504_v9, %v1389_v37 }
 0x36b   : > { %1470 = vrot.lane.b32.xlu0 %v1433_v57, %s1919_s14  ;;  %1468 = vrot.lane.b32.xlu1 %v1432_v46, %s1919_s14 }
 0x36c   : > { %v1395_v48 = vpop.permute.xlu0 %1394  ;;  %v1393_v28 = vpop.permute.xlu1 %1392 }
 0x36d   : > { %v1435_v49 = vadd.f32 %v2512_v42, %v1395_v48  ;;  %v1434_v55 = vadd.f32 %v2514_v3, %v1393_v28 }
 0x36f   : > { %1474 = vrot.lane.b32.xlu0 %v1435_v49, %s1919_s14  ;;  %1472 = vrot.lane.b32.xlu1 %v1434_v55, %s1919_s14 }
 0x370   : > { %v1399_v30 = vpop.permute.xlu0 %1398  ;;  %v1397_v43 = vpop.permute.xlu1 %1396 }
 0x371   : > { %v1437_v59 = vadd.f32 %v2522_v61, %v1399_v30  ;;  %v1436_v9 = vadd.f32 %v2524_v4, %v1397_v43  ;;  %v2730_v4 = vld [vmem:[#allocation11_spill] sm:$0xff] }
 0x373   : > { %1478 = vrot.lane.b32.xlu0 %v1437_v59, %s1919_s14  ;;  %1476 = vrot.lane.b32.xlu1 %v1436_v9, %s1919_s14 }
 0x374   : > { %v1403_v41 = vpop.permute.xlu0 %1402  ;;  %v1401_v44 = vpop.permute.xlu1 %1400 }
 0x375   : > { %v1439_v42 = vadd.f32 %v2530_v0, %v1403_v41  ;;  %v1438_v3 = vadd.f32 %v2532_v8, %v1401_v44  ;;  %v2731_v0 = vld [vmem:[#allocation12_spill] sm:$0xff] }
 0x377   : > { %1482 = vrot.lane.b32.xlu0 %v1439_v42, %s1919_s14  ;;  %1480 = vrot.lane.b32.xlu1 %v1438_v3, %s1919_s14 }
 0x378   : > { %v1407_v36 = vpop.permute.xlu0 %1406  ;;  %v1405_v62 = vpop.permute.xlu1 %1404 }
 0x379   : > { %v1441_v61 = vadd.f32 %v2538_v12, %v1407_v36  ;;  %v1440_v15 = vadd.f32 %v2730_v4, %v1405_v62 }
 0x37b   : > { %1486 = vrot.lane.b32.xlu0 %v1441_v61, %s1919_s14  ;;  %1484 = vrot.lane.b32.xlu1 %v1440_v15, %s1919_s14 }
 0x37c   : > { %v1411_v13 = vpop.permute.xlu0 %1410  ;;  %v1409_v24 = vpop.permute.xlu1 %1408 }
 0x37d   : > { %v1443_v19 = vadd.f32 %v2731_v0, %v1411_v13  ;;  %v1442_v8 = vadd.f32 %v2732_v11, %v1409_v24 }
 0x37f   : > { %1490 = vrot.lane.b32.xlu0 %v1443_v19, %s1919_s14  ;;  %1488 = vrot.lane.b32.xlu1 %v1442_v8, %s1919_s14 }
 0x3d5   : > { %v1463_v12 = vpop.permute.xlu0 %1462  ;;  %v1461_v58 = vpop.permute.xlu1 %1460 }
 0x3d6   : > { %1509 = vst.msk [vmem:[%s2654_s30 + $0x8] sm:$0xff] %vm312_vm0, %v1463_v12  ;;  %1508 = vst.msk [vmem:[%s2654_s30] sm:$0xff] %vm312_vm0, %v1461_v58 }
 0x3d9   : > { %v1467_v26 = vpop.permute.xlu0 %1466  ;;  %v1465_v17 = vpop.permute.xlu1 %1464 }
 0x3da   : > { %1511 = vst.msk [vmem:[%s2654_s30 + $0x18] sm:$0xff] %vm312_vm0, %v1467_v26  ;;  %1510 = vst.msk [vmem:[%s2654_s30 + $0x10] sm:$0xff] %vm312_vm0, %v1465_v17 }
 0x3dd   : > { %v1471_v6 = vpop.permute.xlu0 %1470  ;;  %v1469_v10 = vpop.permute.xlu1 %1468 }
 0x3de   : > { %1513 = vst.msk [vmem:[%s2654_s30 + $0x28] sm:$0xff] %vm312_vm0, %v1471_v6  ;;  %1512 = vst.msk [vmem:[%s2654_s30 + $0x20] sm:$0xff] %vm312_vm0, %v1469_v10 }
 0x3e1   : > { %v1475_v34 = vpop.permute.xlu0 %1474  ;;  %v1473_v22 = vpop.permute.xlu1 %1472 }
 0x3e2   : > { %1515 = vst.msk [vmem:[%s2654_s30 + $0x38] sm:$0xff] %vm312_vm0, %v1475_v34  ;;  %1514 = vst.msk [vmem:[%s2654_s30 + $0x30] sm:$0xff] %vm312_vm0, %v1473_v22 }
 0x3e5   : > { %v1479_v23 = vpop.permute.xlu0 %1478  ;;  %v1477_v47 = vpop.permute.xlu1 %1476 }
 0x3e6   : > { %1517 = vst.msk [vmem:[%s2654_s30 + $0x48] sm:$0xff] %vm312_vm0, %v1479_v23  ;;  %1516 = vst.msk [vmem:[%s2654_s30 + $0x40] sm:$0xff] %vm312_vm0, %v1477_v47 }
 0x3e9   : > { %v1483_v21 = vpop.permute.xlu0 %1482  ;;  %v1481_v20 = vpop.permute.xlu1 %1480 }
 0x3ea   : > { %1519 = vst.msk [vmem:[%s2654_s30 + $0x58] sm:$0xff] %vm312_vm0, %v1483_v21  ;;  %1518 = vst.msk [vmem:[%s2654_s30 + $0x50] sm:$0xff] %vm312_vm0, %v1481_v20 }
 0x3ed   : > { %v1487_v18 = vpop.permute.xlu0 %1486  ;;  %v1485_v45 = vpop.permute.xlu1 %1484 }
 0x3ee   : > { %1521 = vst.msk [vmem:[%s2654_s30 + $0x68] sm:$0xff] %vm312_vm0, %v1487_v18  ;;  %1520 = vst.msk [vmem:[%s2654_s30 + $0x60] sm:$0xff] %vm312_vm0, %v1485_v45 }
 0x3f1   : > { %v1491_v27 = vpop.permute.xlu0 %1490  ;;  %v1489_v40 = vpop.permute.xlu1 %1488 }
 0x3f2   : > { %1523 = vst.msk [vmem:[%s2654_s30 + $0x78] sm:$0xff] %vm312_vm0, %v1491_v27  ;;  %1522 = vst.msk [vmem:[%s2654_s30 + $0x70] sm:$0xff] %vm312_vm0, %v1489_v40 }
 0x3f3 PF: > { %s15_s18 = sadd.s32 1, %s1917_s18  }
 0x3f4   : > { %p12_p4 = scmp.ge.s32.totalorder %s15_s18, 4  }
 0x3f6   :  { %14 = sbr.rel (!%p12_p4) target bundleno = 1 (0x1), region = 76 }

</bundles_post_ra>
